<compile_context>
chip_gen: v7x
topology: tpu7x:2x2x1
jax: 0.10.0
libtpu: 0.0.40
codegen_flags: <defaults>
</compile_context>

<pallas_src>
import jax
import jax.numpy as jnp
from jax.experimental import pallas as pl
from jax.experimental.pallas import tpu as pltpu


def rnn_kernel(x_ref, wh_ref, wp_ref, slab_ref, out_ref):
    """Whole-sequence vanilla RNN + linear head + softmax, fully in VMEM.

    x_ref   : (B, T)            native layout, no wrapper transpose
    wh_ref  : (H, H)  = w_h2h^T (pre-transposed once at param-prep time)
    wp_ref  : (H, C)  = w_h2p^T (pre-transposed once at param-prep time)
    slab_ref: (3, W)  W = max(H, C); row 0 = w_i2h^T (input_dim == 1),
                      row 1 = bias_h^T, row 2 = bias_p^T zero-padded to W
    out_ref : (B, C)  softmax probabilities
    """
    x = x_ref[...]          # (B, T)
    wh = wh_ref[...]        # (H, H)
    wp = wp_ref[...]        # (H, C)
    slab = slab_ref[...]    # (3, W)

    B, T = x.shape
    H = wh.shape[0]
    C = wp.shape[1]

    # Static prefix slices of the packed small-operand slab (one DMA instead
    # of three for wi / bias_h / bias_p).
    wi = slab[0:1, :H]      # (1, H)
    bh = slab[1:2, :H]      # (1, H)
    bp = slab[2:3, :C]      # (1, C)

    # Hoist the input projection + hidden bias for ALL steps off the serial
    # chain (input_dim == 1, so x_t @ w_i2h^T == scalar-per-row * wi).
    # Broadcasts are outside the loop (broadcast_in_dim is not CSE'd).
    xb = x[:, :, None] * wi[None, :, :] + bh[None, :, :]     # (B, T, H), VPU

    # t = 0: h_prev is zero, so the h @ wh contribution vanishes.
    h = jnp.tanh(xb[:, 0, :])                                 # (B, H), EUP
    # Remaining steps: one MXU matmul + one EUP tanh on the critical chain.
    # T is small & static; the recurrence is inherently sequential -> unroll.
    for t in range(1, T):
        h = jnp.tanh(xb[:, t, :]
                     + jnp.dot(h, wh, preferred_element_type=jnp.float32))

    # Output projection + numerically-stable softmax over classes (dim=1).
    p = jnp.dot(h, wp, preferred_element_type=jnp.float32) + bp   # (B, C)
    m = jnp.max(p, axis=-1, keepdims=True)
    e = jnp.exp(p - m)                                             # EUP
    out_ref[...] = e / jnp.sum(e, axis=-1, keepdims=True)


def prepare_vanilla_rnn_params(w_i2h, w_h2h, w_h2p, bias_h, bias_p):
    """One-time layout prep (OUTSIDE the per-call hot path).

    Pre-transposes the weights for MXU right-multiplication and packs the
    three tiny (1, *) operands into a single (3, max(H, C)) slab so the
    per-call pallas_call sees only 4 inputs: x, wh^T, wp^T, slab.
    """
    H, I = w_i2h.shape
    C = w_h2p.shape[0]
    assert I == 1, "PyTorch forward's view(-1, 1) implies input_dim == 1"

    wh_T = jnp.asarray(w_h2h, jnp.float32).T              # (H, H)
    wp_T = jnp.asarray(w_h2p, jnp.float32).T              # (H, C)

    W = max(H, C)
    wi_row = jnp.zeros((1, W), jnp.float32).at[:, :H].set(
        jnp.asarray(w_i2h, jnp.float32).reshape(1, H))
    bh_row = jnp.zeros((1, W), jnp.float32).at[:, :H].set(
        jnp.asarray(bias_h, jnp.float32).reshape(1, H))
    bp_row = jnp.zeros((1, W), jnp.float32).at[:, :C].set(
        jnp.asarray(bias_p, jnp.float32).reshape(1, C))
    slab = jnp.concatenate([wi_row, bh_row, bp_row], axis=0)   # (3, W)

    return wh_T, wp_T, slab


def vanilla_rnn_forward(x, wh_T, wp_T, slab):
    """Per-call wrapper: no layout ops, just the pallas_call (x must be f32)."""
    B, T = x.shape
    C = wp_T.shape[1]

    # Gridless whole-in-VMEM: every operand is a single (8,128)-padded tile.
    vmem = pl.BlockSpec(memory_space=pltpu.MemorySpace.VMEM)
    return pl.pallas_call(
        rnn_kernel,
        out_shape=jax.ShapeDtypeStruct((B, C), jnp.float32),
        in_specs=[vmem, vmem, vmem, vmem],
        out_specs=vmem,
    )(x, wh_T, wp_T, slab)


def vanilla_rnn_reference(x, w_i2h, w_h2h, w_h2p, bias_h, bias_p):
    """Pure-JAX reference mirroring the PyTorch forward, precision-pinned."""
    hp = jax.lax.Precision.HIGHEST
    B, T = x.shape
    H = w_h2h.shape[0]
    h = jnp.zeros((B, H), jnp.float32)
    for t in range(T):
        x_t = x[:, t].reshape(-1, 1)
        h = jnp.tanh(jnp.dot(x_t, w_i2h.T, precision=hp)
                     + jnp.dot(h, w_h2h.T, precision=hp)
                     + bias_h.T)
    p = jnp.dot(h, w_h2p.T, precision=hp) + bias_p.T
    return jax.nn.softmax(p, axis=1)


if __name__ == "__main__":
    # Shapes consistent with the module: scalar-per-step sequences.
    seq_length, input_dim = 8, 1
    num_hidden, num_classes, batch_size = 32, 10, 8

    key = jax.random.PRNGKey(0)
    ks = jax.random.split(key, 6)
    # Deterministic synthetic parameters, ~ N(0, 0.1) like the module init.
    w_i2h = 0.1 * jax.random.normal(ks[0], (num_hidden, input_dim), jnp.float32)
    w_h2h = 0.1 * jax.random.normal(ks[1], (num_hidden, num_hidden), jnp.float32)
    w_h2p = 0.1 * jax.random.normal(ks[2], (num_classes, num_hidden), jnp.float32)
    bias_h = 0.1 * jax.random.normal(ks[3], (num_hidden, 1), jnp.float32)
    bias_p = 0.1 * jax.random.normal(ks[4], (num_classes, 1), jnp.float32)
    x = jax.random.normal(ks[5], (batch_size, seq_length), jnp.float32)

    # One-time layout prep (outside the per-call path).
    wh_T, wp_T, slab = prepare_vanilla_rnn_params(
        w_i2h, w_h2h, w_h2p, bias_h, bias_p)

    out = vanilla_rnn_forward(x, wh_T, wp_T, slab)
    out = jax.block_until_ready(out)

    ref = vanilla_rnn_reference(x, w_i2h, w_h2h, w_h2p, bias_h, bias_p)
    assert out.shape == (batch_size, num_classes)
    assert jnp.allclose(out, ref, atol=1e-5, rtol=1e-5), "mismatch vs reference"

    print("KERNEL_OK")
</pallas_src>

<mosaic_0001>
module attributes {stable_mosaic.version = 11 : i64} {
  func.func @rnn_kernel(%arg0: memref<8x8xf32, #tpu.memory_space<vmem>>, %arg1: memref<32x32xf32, #tpu.memory_space<vmem>>, %arg2: memref<32x10xf32, #tpu.memory_space<vmem>>, %arg3: memref<3x32xf32, #tpu.memory_space<vmem>>, %arg4: memref<8x10xf32, #tpu.memory_space<vmem>>) attributes {dimension_semantics = [], scalar_prefetch = 0 : i64, scratch_operands = 0 : i64, tpu.core_type = #tpu.core_type<tc>} {
    %c0 = arith.constant 0 : index
    %c0_0 = arith.constant 0 : index
    %0 = vector.load %arg0[%c0, %c0_0] : memref<8x8xf32, #tpu.memory_space<vmem>>, vector<8x8xf32>
    %c0_1 = arith.constant 0 : index
    %c0_2 = arith.constant 0 : index
    %1 = vector.load %arg1[%c0_1, %c0_2] : memref<32x32xf32, #tpu.memory_space<vmem>>, vector<32x32xf32>
    %c0_3 = arith.constant 0 : index
    %c0_4 = arith.constant 0 : index
    %2 = vector.load %arg2[%c0_3, %c0_4] : memref<32x10xf32, #tpu.memory_space<vmem>>, vector<32x10xf32>
    %c0_5 = arith.constant 0 : index
    %c0_6 = arith.constant 0 : index
    %3 = vector.load %arg3[%c0_5, %c0_6] : memref<3x32xf32, #tpu.memory_space<vmem>>, vector<3x32xf32>
    %4 = vector.extract_strided_slice %3 {offsets = [0, 0], sizes = [1, 32], strides = [1, 1]} : vector<3x32xf32> to vector<1x32xf32>
    %5 = vector.extract_strided_slice %3 {offsets = [1, 0], sizes = [1, 32], strides = [1, 1]} : vector<3x32xf32> to vector<1x32xf32>
    %6 = vector.extract_strided_slice %3 {offsets = [2, 0], sizes = [1, 10], strides = [1, 1]} : vector<3x32xf32> to vector<1x10xf32>
    %7 = vector.shape_cast %0 : vector<8x8xf32> to vector<8x8x1xf32>
    %8 = vector.shape_cast %4 : vector<1x32xf32> to vector<1x1x32xf32>
    %9 = vector.broadcast %7 : vector<8x8x1xf32> to vector<8x8x32xf32>
    %10 = vector.broadcast %8 : vector<1x1x32xf32> to vector<8x8x32xf32>
    %11 = arith.mulf %9, %10 : vector<8x8x32xf32>
    %12 = vector.shape_cast %5 : vector<1x32xf32> to vector<1x1x32xf32>
    %13 = vector.broadcast %12 : vector<1x1x32xf32> to vector<8x8x32xf32>
    %14 = arith.addf %11, %13 : vector<8x8x32xf32>
    %15 = vector.extract_strided_slice %14 {offsets = [0, 0, 0], sizes = [8, 1, 32], strides = [1, 1, 1]} : vector<8x8x32xf32> to vector<8x1x32xf32>
    %16 = vector.shape_cast %15 : vector<8x1x32xf32> to vector<8x32xf32>
    %17 = math.tanh %16 : vector<8x32xf32>
    %18 = vector.extract_strided_slice %14 {offsets = [0, 1, 0], sizes = [8, 1, 32], strides = [1, 1, 1]} : vector<8x8x32xf32> to vector<8x1x32xf32>
    %19 = vector.shape_cast %18 : vector<8x1x32xf32> to vector<8x32xf32>
    %cst = arith.constant dense<0.000000e+00> : vector<8x32xf32>
    %20 = tpu.matmul %17, %1, %cst {dimension_numbers = #tpu.dot_dimension_numbers<[1], [0], [0], [1], [0, 0, 1, 1], [], []>} : vector<8x32xf32>, vector<32x32xf32>, vector<8x32xf32> -> vector<8x32xf32>
    %21 = arith.addf %19, %20 : vector<8x32xf32>
    %22 = math.tanh %21 : vector<8x32xf32>
    %23 = vector.extract_strided_slice %14 {offsets = [0, 2, 0], sizes = [8, 1, 32], strides = [1, 1, 1]} : vector<8x8x32xf32> to vector<8x1x32xf32>
    %24 = vector.shape_cast %23 : vector<8x1x32xf32> to vector<8x32xf32>
    %cst_7 = arith.constant dense<0.000000e+00> : vector<8x32xf32>
    %25 = tpu.matmul %22, %1, %cst_7 {dimension_numbers = #tpu.dot_dimension_numbers<[1], [0], [0], [1], [0, 0, 1, 1], [], []>} : vector<8x32xf32>, vector<32x32xf32>, vector<8x32xf32> -> vector<8x32xf32>
    %26 = arith.addf %24, %25 : vector<8x32xf32>
    %27 = math.tanh %26 : vector<8x32xf32>
    %28 = vector.extract_strided_slice %14 {offsets = [0, 3, 0], sizes = [8, 1, 32], strides = [1, 1, 1]} : vector<8x8x32xf32> to vector<8x1x32xf32>
    %29 = vector.shape_cast %28 : vector<8x1x32xf32> to vector<8x32xf32>
    %cst_8 = arith.constant dense<0.000000e+00> : vector<8x32xf32>
    %30 = tpu.matmul %27, %1, %cst_8 {dimension_numbers = #tpu.dot_dimension_numbers<[1], [0], [0], [1], [0, 0, 1, 1], [], []>} : vector<8x32xf32>, vector<32x32xf32>, vector<8x32xf32> -> vector<8x32xf32>
    %31 = arith.addf %29, %30 : vector<8x32xf32>
    %32 = math.tanh %31 : vector<8x32xf32>
    %33 = vector.extract_strided_slice %14 {offsets = [0, 4, 0], sizes = [8, 1, 32], strides = [1, 1, 1]} : vector<8x8x32xf32> to vector<8x1x32xf32>
    %34 = vector.shape_cast %33 : vector<8x1x32xf32> to vector<8x32xf32>
    %cst_9 = arith.constant dense<0.000000e+00> : vector<8x32xf32>
    %35 = tpu.matmul %32, %1, %cst_9 {dimension_numbers = #tpu.dot_dimension_numbers<[1], [0], [0], [1], [0, 0, 1, 1], [], []>} : vector<8x32xf32>, vector<32x32xf32>, vector<8x32xf32> -> vector<8x32xf32>
    %36 = arith.addf %34, %35 : vector<8x32xf32>
    %37 = math.tanh %36 : vector<8x32xf32>
    %38 = vector.extract_strided_slice %14 {offsets = [0, 5, 0], sizes = [8, 1, 32], strides = [1, 1, 1]} : vector<8x8x32xf32> to vector<8x1x32xf32>
    %39 = vector.shape_cast %38 : vector<8x1x32xf32> to vector<8x32xf32>
    %cst_10 = arith.constant dense<0.000000e+00> : vector<8x32xf32>
    %40 = tpu.matmul %37, %1, %cst_10 {dimension_numbers = #tpu.dot_dimension_numbers<[1], [0], [0], [1], [0, 0, 1, 1], [], []>} : vector<8x32xf32>, vector<32x32xf32>, vector<8x32xf32> -> vector<8x32xf32>
    %41 = arith.addf %39, %40 : vector<8x32xf32>
    %42 = math.tanh %41 : vector<8x32xf32>
    %43 = vector.extract_strided_slice %14 {offsets = [0, 6, 0], sizes = [8, 1, 32], strides = [1, 1, 1]} : vector<8x8x32xf32> to vector<8x1x32xf32>
    %44 = vector.shape_cast %43 : vector<8x1x32xf32> to vector<8x32xf32>
    %cst_11 = arith.constant dense<0.000000e+00> : vector<8x32xf32>
    %45 = tpu.matmul %42, %1, %cst_11 {dimension_numbers = #tpu.dot_dimension_numbers<[1], [0], [0], [1], [0, 0, 1, 1], [], []>} : vector<8x32xf32>, vector<32x32xf32>, vector<8x32xf32> -> vector<8x32xf32>
    %46 = arith.addf %44, %45 : vector<8x32xf32>
    %47 = math.tanh %46 : vector<8x32xf32>
    %48 = vector.extract_strided_slice %14 {offsets = [0, 7, 0], sizes = [8, 1, 32], strides = [1, 1, 1]} : vector<8x8x32xf32> to vector<8x1x32xf32>
    %49 = vector.shape_cast %48 : vector<8x1x32xf32> to vector<8x32xf32>
    %cst_12 = arith.constant dense<0.000000e+00> : vector<8x32xf32>
    %50 = tpu.matmul %47, %1, %cst_12 {dimension_numbers = #tpu.dot_dimension_numbers<[1], [0], [0], [1], [0, 0, 1, 1], [], []>} : vector<8x32xf32>, vector<32x32xf32>, vector<8x32xf32> -> vector<8x32xf32>
    %51 = arith.addf %49, %50 : vector<8x32xf32>
    %52 = math.tanh %51 : vector<8x32xf32>
    %cst_13 = arith.constant dense<0.000000e+00> : vector<8x10xf32>
    %53 = tpu.matmul %52, %2, %cst_13 {dimension_numbers = #tpu.dot_dimension_numbers<[1], [0], [0], [1], [0, 0, 1, 1], [], []>} : vector<8x32xf32>, vector<32x10xf32>, vector<8x10xf32> -> vector<8x10xf32>
    %54 = vector.broadcast %6 : vector<1x10xf32> to vector<8x10xf32>
    %55 = arith.addf %53, %54 : vector<8x10xf32>
    %cst_14 = arith.constant dense<0xFF800000> : vector<8xf32>
    %56 = vector.multi_reduction <maximumf>, %55, %cst_14 [1] : vector<8x10xf32> to vector<8xf32>
    %57 = vector.shape_cast %56 : vector<8xf32> to vector<8x1xf32>
    %58 = vector.broadcast %57 : vector<8x1xf32> to vector<8x10xf32>
    %59 = arith.subf %55, %58 : vector<8x10xf32>
    %60 = math.exp %59 : vector<8x10xf32>
    %cst_15 = arith.constant dense<0.000000e+00> : vector<8xf32>
    %61 = vector.multi_reduction <add>, %60, %cst_15 [1] : vector<8x10xf32> to vector<8xf32>
    %62 = vector.shape_cast %61 : vector<8xf32> to vector<8x1xf32>
    %63 = vector.broadcast %62 : vector<8x1xf32> to vector<8x10xf32>
    %64 = arith.divf %60, %63 : vector<8x10xf32>
    %c0_16 = arith.constant 0 : index
    %c0_17 = arith.constant 0 : index
    %65 = vector.load %arg4[%c0_16, %c0_17] : memref<8x10xf32, #tpu.memory_space<vmem>>, vector<8x10xf32>
    tpu.vector_store %arg4[%c0_16, %c0_17], %64 {strides = array<i32>} : memref<8x10xf32, #tpu.memory_space<vmem>>, vector<8x10xf32>,
    return
  }
}

</mosaic_0001>

<bundles_post_ra>
// kernel: tpu_custom_call.1
= control target key start
LH: loop header
LB: loop body
LE: loop exit
PB: predicated region body
PF: predicated region fallthrough
CT: control target
= control target key end

     0   :  { %v28_v0 = vlaneseq  ;;  %s1762_s0 = inlined_call_operand.vmem [shape: f32[8,8], index: 0, kind: input, shape index: {}]   ;;  %s1763_s1 = inlined_call_operand.vmem [shape: f32[32,32], index: 1, kind: input, shape index: {}]   ;;  %s1764_s2 = inlined_call_operand.vmem [shape: f32[32,10], index: 2, kind: input, shape index: {}]   ;;  %s1765_s3 = inlined_call_operand.vmem [shape: f32[3,32], index: 3, kind: input, shape index: {}]   ;;  %s1766_s4 = inlined_call_operand.hbm [shape: f32[8,10], index: 4, kind: output, shape index: {}]  }
   0x1   :  { %9 = vsyncpa [#allocation3], 0  ;;  %v18_v2 = vld [vmem:[%s1762_s0] sm:$0xff]  ;;  %v20_v14 = vld [vmem:[%s1763_s1 + $0x8] sm:$0xff]  ;;  %v1475_v15 = vmov 0.0|0.0   ;;  %vm1476_vm0 = vmmov 0  }
   0x2   :  { %v1504_v1 = vshrl.u32 %v28_v0, 7  ;;  %v19_v13 = vld [vmem:[%s1763_s1] sm:$0xff]  ;;  %1267 = vmatprep.subr.bf16.mxu0 %v1475_v15  ;;  %v21_v17 = vld [vmem:[%s1763_s1 + $0x10] sm:$0xff]  ;;  %v22_v18 = vld [vmem:[%s1763_s1 + $0x18] sm:$0xff]  ;;  %v1477_v19 = vmov 0.0   ;;  %1273 = vmatprep.subr.bf16.mxu1 %v1475_v15  ;;  %vm125_vm1 = vcmask 1041409  }
   0x3   :  { %v1524_v16 = vpack.c.bf16 %v20_v14, %v19_v13  ;;  %1187 = vmatprep.mubr.msk.f32.mxu0 %vm1476_vm0, %v1477_v19  ;;  %1198 = vmatprep.mubr.msk.f32.mxu1 %vm1476_vm0, %v1477_v19  ;;  %v1540_v24 = vpack.c.bf16 %v22_v18, %v21_v17  ;;  %v1552_v27 = vld [vmem:[%s1765_s3] sm:$0x7]  ;;  %vm128_vm2 = vcmask 1042434   ;;  %vm131_vm3 = vcmask 1043459  }
   0x4   :  { %v37_v3 = vsub.s32 1, %v1504_v1  ;;  %v30_v4 = vsub.s32 0, %v1504_v1  ;;  %v44_v5 = vsub.s32 2, %v1504_v1  ;;  %v51_v6 = vsub.s32 3, %v1504_v1 }
   0x5   :  { %v58_v11 = vsub.s32 4, %v1504_v1  ;;  %v65_v12 = vsub.s32 5, %v1504_v1  ;;  %v72_v22 = vsub.s32 6, %v1504_v1  ;;  %v79_v23 = vsub.s32 7, %v1504_v1  ;;  %1269 = vmatpush3.bf16.msra.mxu0 %v1524_v16  ;;  %1275 = vmatpush3.bf16.msra.mxu1 %v1524_v16 }
   0x6   :  { %v38_v7 = vrot.slane %v18_v2, %v37_v3  ;;  %v31_v8 = vrot.slane %v18_v2, %v30_v4  ;;  %v45_v9 = vrot.slane %v18_v2, %v44_v5  ;;  %v52_v10 = vrot.slane %v18_v2, %v51_v6  ;;  %1270 = vmatprep.subr.bf16.mxu0 %v1475_v15 }
   0x7   :  { %v59_v20 = vrot.slane %v18_v2, %v58_v11  ;;  %v66_v21 = vrot.slane %v18_v2, %v65_v12  ;;  %1276 = vmatprep.subr.bf16.mxu1 %v1475_v15  ;;  %v73_v25 = vrot.slane %v18_v2, %v72_v22  ;;  %v80_v26 = vrot.slane %v18_v2, %v79_v23 }
   0x8   :  { %40 = vbcast.lane.b32.xlu0 %v38_v7, 256  ;;  %33 = vbcast.lane.b32.xlu1 %v31_v8, 256  ;;  %v87_v28 = vrot.slane %v1552_v27, %v30_v4  ;;  %v99_v29 = vrot.slane %v1552_v27, %v37_v3  ;;  %vm134_vm4 = vcmask 1044484   ;;  %vm137_vm5 = vcmask 1045509  }
   0x9   :  { %1272 = vmatpush3.bf16.msra.mxu0 %v1540_v24  ;;  %1278 = vmatpush3.bf16.msra.mxu1 %v1540_v24  ;;  %vm140_vm6 = vcmask 1046534   ;;  %vm143_vm7 = vcmask 1047559   ;;  %vm145_vm8 = vcmask 261120   ;;  %vm1104_vm9 = vcmask 80896  }
   0xa   :  { %1279 = vmatprep.subr.bf16.mxu0 %v1475_v15  ;;  %1285 = vmatprep.subr.bf16.mxu1 %v1475_v15 }
   0xc   :  { %47 = vbcast.lane.b32.xlu0 %v45_v9, 256  ;;  %54 = vbcast.lane.b32.xlu1 %v52_v10, 256 }
  0x10   :  { %61 = vbcast.lane.b32.xlu0 %v59_v20, 256  ;;  %68 = vbcast.lane.b32.xlu1 %v66_v21, 256 }
  0x14   :  { %75 = vbcast.lane.b32.xlu0 %v73_v25, 256  ;;  %82 = vbcast.lane.b32.xlu1 %v80_v26, 256 }
  0x7a   :  { %v41_v30 = vpop.permute.xlu0 %40  ;;  %v34_v31 = vpop.permute.xlu1 %33 }
  0x7b   :  { %v89_v32 = vmul.f32 %v87_v28, %v41_v30  ;;  %v88_v33 = vmul.f32 %v87_v28, %v34_v31 }
  0x7d   :  { %v1556_v34 = vadd.f32 %v99_v29, %v89_v32  ;;  %v1558_v35 = vadd.f32 %v99_v29, %v88_v33 }
  0x7e   :  { %v48_v36 = vpop.permute.xlu0 %47  ;;  %v55_v37 = vpop.permute.xlu1 %54 }
  0x7f   :  { %v90_v38 = vmul.f32 %v87_v28, %v48_v36  ;;  %v91_v39 = vmul.f32 %v87_v28, %v55_v37  ;;  %1319 = vtanh.f32 %v1556_v34 }
  0x80   :  { %1321 = vtanh.f32 %v1558_v35 }
  0x81   :  { %v1561_v40 = vadd.f32 %v99_v29, %v90_v38  ;;  %v1563_v41 = vadd.f32 %v99_v29, %v91_v39 }
  0x82   :  { %v62_v42 = vpop.permute.xlu0 %61  ;;  %v69_v43 = vpop.permute.xlu1 %68 }
  0x83   :  { %v92_v44 = vmul.f32 %v87_v28, %v62_v42  ;;  %v93_v45 = vmul.f32 %v87_v28, %v69_v43  ;;  %1323 = vtanh.f32 %v1561_v40 }
  0x84   :  { %1325 = vtanh.f32 %v1563_v41 }
  0x85   :  { %v1568_v46 = vadd.f32 %v99_v29, %v92_v44  ;;  %v1570_v47 = vadd.f32 %v99_v29, %v93_v45 }
  0x86   :  { %v76_v48 = vpop.permute.xlu0 %75  ;;  %v83_v49 = vpop.permute.xlu1 %82 }
  0x87   :  { %v94_v50 = vmul.f32 %v87_v28, %v76_v48  ;;  %v95_v51 = vmul.f32 %v87_v28, %v83_v49  ;;  %1327 = vtanh.f32 %v1568_v46 }
  0x88   :  { %1329 = vtanh.f32 %v1570_v47 }
  0x89   :  { %v1574_v52 = vadd.f32 %v99_v29, %v94_v50  ;;  %v1576_v53 = vadd.f32 %v99_v29, %v95_v51  ;;  %v1320_v54 = vpop.eup %1319 }
  0x8a   :  { %v124_v55 = vrot.slane %v1320_v54, 7  ;;  %v1322_v56 = vpop.eup %1321 }
  0x8b   :  { %1331 = vtanh.f32 %v1574_v52 }
  0x8c   :  { %1333 = vtanh.f32 %v1576_v53  ;;  %v126_v60 = vsel %vm125_vm1, %v124_v55, %v1322_v56 }
  0x8d   :  { %v1324_v57 = vpop.eup %1323 }
  0x8e   :  { %v1326_v58 = vpop.eup %1325  ;;  %v127_v59 = vrot.slane %v1324_v57, 6 }
  0x8f   :  { %v130_v61 = vrot.slane %v1326_v58, 5 }
  0x90   :  { %v129_v62 = vsel %vm128_vm2, %v127_v59, %v126_v60 }
  0x91   :  { %v1328_v63 = vpop.eup %1327  ;;  %v132_v3 = vsel %vm131_vm3, %v130_v61, %v129_v62 }
  0x92   :  { %v1330_v0 = vpop.eup %1329  ;;  %v133_v2 = vrot.slane %v1328_v63, 4 }
  0x93   :  { %v136_v4 = vrot.slane %v1330_v0, 3 }
  0x94   :  { %v135_v6 = vsel %vm134_vm4, %v133_v2, %v132_v3 }
  0x95   :  { %v1332_v7 = vpop.eup %1331  ;;  %v138_v10 = vsel %vm137_vm5, %v136_v4, %v135_v6 }
  0x96   :  { %v1334_v8 = vpop.eup %1333  ;;  %v139_v9 = vrot.slane %v1332_v7, 2 }
  0x97   :  { %v142_v11 = vrot.slane %v1334_v8, 1 }
  0x98   :  { %v141_v12 = vsel %vm140_vm6, %v139_v9, %v138_v10 }
  0x99   :  { %v144_v13 = vsel %vm143_vm7, %v142_v11, %v141_v12 }
  0x9a   :  { %1188 = vmatmul.mubr.msk.f32.vlgmr.msra.gmra.mrb[0].mxu0 %vm145_vm8, %v144_v13 }
  0x9b   :  { %1281 = vmatpush3.bf16.msra.mxu0 %v1524_v16  ;;  %1209 = vmatprep.mubr.msk.f32.mxu0 %vm1476_vm0, %v1477_v19 }
  0x9c   :  { %1282 = vmatprep.subr.bf16.mxu0 %v1475_v15 }
  0x9f   :  { %1284 = vmatpush3.bf16.msra.mxu0 %v1540_v24 }
  0xa0   :  { %1291 = vmatprep.subr.bf16.mxu0 %v1475_v15 }
 0x16d   :  { %v214_v14 = vpop.f32.mrb[0].mxu0 }
 0x16e   :  { %v219_v17 = vrot.slane %v214_v14, 7  ;;  %v220_v18 = vrot.slane %v214_v14, 1  ;;  %v221_v20 = vrot.slane %v214_v14, 2  ;;  %v222_v21 = vrot.slane %v214_v14, 3  ;;  %v1189_v22 = vpop.f32.mrb[1].mxu0 }
 0x16f   :  { %v235_v23 = vadd.f32 %v214_v14, %v1556_v34  ;;  %v223_v25 = vrot.slane %v214_v14, 4  ;;  %v224_v26 = vrot.slane %v214_v14, 5  ;;  %v225_v30 = vrot.slane %v214_v14, 6 }
 0x170   :  { %v234_v28 = vadd.f32 %v219_v17, %v1558_v35  ;;  %v236_v29 = vadd.f32 %v220_v18, %v1561_v40  ;;  %v237_v31 = vadd.f32 %v221_v20, %v1563_v41  ;;  %v238_v32 = vadd.f32 %v222_v21, %v1568_v46 }
 0x171   :  { %1335 = vtanh.f32 %v235_v23  ;;  %v239_v33 = vadd.f32 %v223_v25, %v1570_v47  ;;  %v240_v36 = vadd.f32 %v224_v26, %v1574_v52  ;;  %v241_v37 = vadd.f32 %v225_v30, %v1576_v53 }
 0x172   :  { %1337 = vtanh.f32 %v234_v28 }
 0x173   :  { %1339 = vtanh.f32 %v236_v29 }
 0x174   :  { %1341 = vtanh.f32 %v237_v31 }
 0x175   :  { %1343 = vtanh.f32 %v238_v32 }
 0x176   :  { %1345 = vtanh.f32 %v239_v33 }
 0x177   :  { %1347 = vtanh.f32 %v240_v36 }
 0x178   :  { %1349 = vtanh.f32 %v241_v37 }
 0x17b   :  { %v1336_v38 = vpop.eup %1335 }
 0x17c   :  { %v1338_v39 = vpop.eup %1337 }
 0x17d   :  { %v1340_v42 = vpop.eup %1339  ;;  %v258_v43 = vrot.slane %v1338_v39, 1 }
 0x17e   :  { %v1342_v44 = vpop.eup %1341  ;;  %v260_v45 = vrot.slane %v1340_v42, 7 }
 0x17f   :  { %v1344_v48 = vpop.eup %1343  ;;  %v259_v49 = vsel %vm125_vm1, %v1336_v38, %v258_v43  ;;  %v262_v50 = vrot.slane %v1342_v44, 6 }
 0x180   :  { %v1346_v51 = vpop.eup %1345  ;;  %v261_v54 = vsel %vm128_vm2, %v260_v45, %v259_v49  ;;  %v264_v55 = vrot.slane %v1344_v48, 5 }
 0x181   :  { %v1348_v56 = vpop.eup %1347  ;;  %v263_v57 = vsel %vm131_vm3, %v262_v50, %v261_v54  ;;  %v266_v58 = vrot.slane %v1346_v51, 4 }
 0x182   :  { %v1350_v59 = vpop.eup %1349  ;;  %v265_v60 = vsel %vm134_vm4, %v264_v55, %v263_v57  ;;  %v268_v61 = vrot.slane %v1348_v56, 3 }
 0x183   :  { %v267_v62 = vsel %vm137_vm5, %v266_v58, %v265_v60  ;;  %v270_v63 = vrot.slane %v1350_v59, 2 }
 0x184   :  { %v269_v0 = vsel %vm140_vm6, %v268_v61, %v267_v62 }
 0x185   :  { %v271_v2 = vsel %vm143_vm7, %v270_v63, %v269_v0 }
 0x186   :  { %1199 = vmatmul.mubr.msk.f32.vlgmr.msra.gmra.mrb[0].mxu1 %vm145_vm8, %v271_v2 }
 0x187   :  { %1287 = vmatpush3.bf16.msra.mxu1 %v1524_v16  ;;  %1220 = vmatprep.mubr.msk.f32.mxu1 %vm1476_vm0, %v1477_v19 }
 0x188   :  { %1288 = vmatprep.subr.bf16.mxu1 %v1475_v15 }
 0x18b   :  { %1290 = vmatpush3.bf16.msra.mxu1 %v1540_v24 }
 0x18c   :  { %1297 = vmatprep.subr.bf16.mxu1 %v1475_v15 }
 0x259   :  { %v340_v3 = vpop.f32.mrb[0].mxu1 }
 0x25a   :  { %v345_v4 = vrot.slane %v340_v3, 6  ;;  %v346_v6 = vrot.slane %v340_v3, 7  ;;  %v347_v7 = vrot.slane %v340_v3, 1  ;;  %v348_v8 = vrot.slane %v340_v3, 2  ;;  %v1200_v9 = vpop.f32.mrb[1].mxu1 }
 0x25b   :  { %v349_v10 = vrot.slane %v340_v3, 3  ;;  %v362_v11 = vadd.f32 %v340_v3, %v1561_v40  ;;  %v350_v12 = vrot.slane %v340_v3, 4  ;;  %v351_v18 = vrot.slane %v340_v3, 5 }
 0x25c   :  { %v360_v13 = vadd.f32 %v345_v4, %v1558_v35  ;;  %v361_v14 = vadd.f32 %v346_v6, %v1556_v34  ;;  %v363_v17 = vadd.f32 %v347_v7, %v1563_v41  ;;  %v364_v20 = vadd.f32 %v348_v8, %v1568_v46 }
 0x25d   :  { %1351 = vtanh.f32 %v362_v11  ;;  %v365_v21 = vadd.f32 %v349_v10, %v1570_v47  ;;  %v366_v22 = vadd.f32 %v350_v12, %v1574_v52  ;;  %v367_v23 = vadd.f32 %v351_v18, %v1576_v53 }
 0x25e   :  { %1353 = vtanh.f32 %v360_v13 }
 0x25f   :  { %1355 = vtanh.f32 %v361_v14 }
 0x260   :  { %1357 = vtanh.f32 %v363_v17 }
 0x261   :  { %1359 = vtanh.f32 %v364_v20 }
 0x262   :  { %1361 = vtanh.f32 %v365_v21 }
 0x263   :  { %1363 = vtanh.f32 %v366_v22 }
 0x264   :  { %1365 = vtanh.f32 %v367_v23 }
 0x267   :  { %v1352_v25 = vpop.eup %1351 }
 0x268   :  { %v1354_v26 = vpop.eup %1353 }
 0x269   :  { %v1356_v28 = vpop.eup %1355  ;;  %v384_v29 = vrot.slane %v1354_v26, 2 }
 0x26a   :  { %v1358_v30 = vpop.eup %1357  ;;  %v385_v31 = vrot.slane %v1356_v28, 1 }
 0x26b   :  { %v1360_v32 = vpop.eup %1359  ;;  %v388_v37 = vrot.slane %v1358_v30, 7 }
 0x26c   :  { %v1362_v33 = vpop.eup %1361  ;;  %v386_v36 = vsel %vm125_vm1, %v385_v31, %v384_v29  ;;  %v390_v42 = vrot.slane %v1360_v32, 6 }
 0x26d   :  { %v1364_v38 = vpop.eup %1363  ;;  %v387_v39 = vsel %vm128_vm2, %v1352_v25, %v386_v36  ;;  %v392_v45 = vrot.slane %v1362_v33, 5 }
 0x26e   :  { %v1366_v43 = vpop.eup %1365  ;;  %v389_v44 = vsel %vm131_vm3, %v388_v37, %v387_v39  ;;  %v394_v49 = vrot.slane %v1364_v38, 4 }
 0x26f   :  { %v391_v48 = vsel %vm134_vm4, %v390_v42, %v389_v44  ;;  %v396_v51 = vrot.slane %v1366_v43, 3 }
 0x270   :  { %v393_v50 = vsel %vm137_vm5, %v392_v45, %v391_v48 }
 0x271   :  { %v395_v54 = vsel %vm140_vm6, %v394_v49, %v393_v50 }
 0x272   :  { %v397_v55 = vsel %vm143_vm7, %v396_v51, %v395_v54 }
 0x273   :  { %1210 = vmatmul.mubr.msk.f32.vlgmr.msra.gmra.mrb[2].mxu0 %vm145_vm8, %v397_v55 }
 0x274   :  { %1293 = vmatpush3.bf16.msra.mxu0 %v1524_v16  ;;  %1231 = vmatprep.mubr.msk.f32.mxu0 %vm1476_vm0, %v1477_v19 }
 0x275   :  { %1294 = vmatprep.subr.bf16.mxu0 %v1475_v15 }
 0x278   :  { %1296 = vmatpush3.bf16.msra.mxu0 %v1540_v24 }
 0x279   :  { %1303 = vmatprep.subr.bf16.mxu0 %v1475_v15 }
 0x346   :  { %v466_v56 = vpop.f32.mrb[2].mxu0 }
 0x347   :  { %v471_v57 = vrot.slane %v466_v56, 5  ;;  %v472_v58 = vrot.slane %v466_v56, 6  ;;  %v473_v59 = vrot.slane %v466_v56, 7  ;;  %v474_v60 = vrot.slane %v466_v56, 1  ;;  %v1211_v61 = vpop.f32.mrb[3].mxu0 }
 0x348   :  { %v475_v62 = vrot.slane %v466_v56, 2  ;;  %v489_v63 = vadd.f32 %v466_v56, %v1563_v41  ;;  %v476_v0 = vrot.slane %v466_v56, 3  ;;  %v477_v6 = vrot.slane %v466_v56, 4 }
 0x349   :  { %v486_v2 = vadd.f32 %v471_v57, %v1558_v35  ;;  %v487_v3 = vadd.f32 %v472_v58, %v1556_v34  ;;  %v488_v4 = vadd.f32 %v473_v59, %v1561_v40  ;;  %v490_v7 = vadd.f32 %v474_v60, %v1568_v46 }
 0x34a   :  { %1367 = vtanh.f32 %v489_v63  ;;  %v491_v8 = vadd.f32 %v475_v62, %v1570_v47  ;;  %v492_v9 = vadd.f32 %v476_v0, %v1574_v52  ;;  %v493_v10 = vadd.f32 %v477_v6, %v1576_v53 }
 0x34b   :  { %1369 = vtanh.f32 %v486_v2 }
 0x34c   :  { %1371 = vtanh.f32 %v487_v3 }
 0x34d   :  { %1373 = vtanh.f32 %v488_v4 }
 0x34e   :  { %1375 = vtanh.f32 %v490_v7 }
 0x34f   :  { %1377 = vtanh.f32 %v491_v8 }
 0x350   :  { %1379 = vtanh.f32 %v492_v9 }
 0x351   :  { %1381 = vtanh.f32 %v493_v10 }
 0x354   :  { %v1368_v11 = vpop.eup %1367 }
 0x355   :  { %v1370_v12 = vpop.eup %1369 }
 0x356   :  { %v1372_v13 = vpop.eup %1371  ;;  %v510_v14 = vrot.slane %v1370_v12, 3 }
 0x357   :  { %v1374_v17 = vpop.eup %1373  ;;  %v511_v18 = vrot.slane %v1372_v13, 2 }
 0x358   :  { %v1376_v20 = vpop.eup %1375  ;;  %v513_v21 = vrot.slane %v1374_v17, 1 }
 0x359   :  { %v1378_v22 = vpop.eup %1377  ;;  %v512_v23 = vsel %vm125_vm1, %v511_v18, %v510_v14  ;;  %v516_v28 = vrot.slane %v1376_v20, 7 }
 0x35a   :  { %v1380_v25 = vpop.eup %1379  ;;  %v514_v26 = vsel %vm128_vm2, %v513_v21, %v512_v23  ;;  %v518_v31 = vrot.slane %v1378_v22, 6 }
 0x35b   :  { %v1382_v29 = vpop.eup %1381  ;;  %v515_v30 = vsel %vm131_vm3, %v1368_v11, %v514_v26  ;;  %v520_v33 = vrot.slane %v1380_v25, 5 }
 0x35c   :  { %v517_v32 = vsel %vm134_vm4, %v516_v28, %v515_v30  ;;  %v522_v37 = vrot.slane %v1382_v29, 4 }
 0x35d   :  { %v519_v36 = vsel %vm137_vm5, %v518_v31, %v517_v32 }
 0x35e   :  { %v521_v38 = vsel %vm140_vm6, %v520_v33, %v519_v36 }
 0x35f   :  { %v523_v39 = vsel %vm143_vm7, %v522_v37, %v521_v38 }
 0x360   :  { %1221 = vmatmul.mubr.msk.f32.vlgmr.msra.gmra.mrb[2].mxu1 %vm145_vm8, %v523_v39 }
 0x361   :  { %1299 = vmatpush3.bf16.msra.mxu1 %v1524_v16  ;;  %1242 = vmatprep.mubr.msk.f32.mxu1 %vm1476_vm0, %v1477_v19 }
 0x362   :  { %1300 = vmatprep.subr.bf16.mxu1 %v1475_v15 }
 0x365   :  { %1302 = vmatpush3.bf16.msra.mxu1 %v1540_v24 }
 0x366   :  { %1309 = vmatprep.subr.bf16.mxu1 %v1475_v15 }
 0x433   :  { %v592_v42 = vpop.f32.mrb[2].mxu1 }
 0x434   :  { %v597_v43 = vrot.slane %v592_v42, 4  ;;  %v598_v44 = vrot.slane %v592_v42, 5  ;;  %v599_v45 = vrot.slane %v592_v42, 6  ;;  %v600_v48 = vrot.slane %v592_v42, 7  ;;  %v1222_v49 = vpop.f32.mrb[3].mxu1 }
 0x435   :  { %v601_v50 = vrot.slane %v592_v42, 1  ;;  %v616_v51 = vadd.f32 %v592_v42, %v1568_v46  ;;  %v602_v54 = vrot.slane %v592_v42, 2  ;;  %v603_v58 = vrot.slane %v592_v42, 3 }
 0x436   :  { %v612_v55 = vadd.f32 %v597_v43, %v1558_v35  ;;  %v613_v56 = vadd.f32 %v598_v44, %v1556_v34  ;;  %v614_v57 = vadd.f32 %v599_v45, %v1561_v40  ;;  %v615_v59 = vadd.f32 %v600_v48, %v1563_v41 }
 0x437   :  { %1383 = vtanh.f32 %v616_v51  ;;  %v617_v60 = vadd.f32 %v601_v50, %v1570_v47  ;;  %v618_v61 = vadd.f32 %v602_v54, %v1574_v52  ;;  %v619_v62 = vadd.f32 %v603_v58, %v1576_v53 }
 0x438   :  { %1385 = vtanh.f32 %v612_v55 }
 0x439   :  { %1387 = vtanh.f32 %v613_v56 }
 0x43a   :  { %1389 = vtanh.f32 %v614_v57 }
 0x43b   :  { %1391 = vtanh.f32 %v615_v59 }
 0x43c   :  { %1393 = vtanh.f32 %v617_v60 }
 0x43d   :  { %1395 = vtanh.f32 %v618_v61 }
 0x43e   :  { %1397 = vtanh.f32 %v619_v62 }
 0x441   :  { %v1384_v63 = vpop.eup %1383 }
 0x442   :  { %v1386_v0 = vpop.eup %1385 }
 0x443   :  { %v1388_v2 = vpop.eup %1387  ;;  %v636_v3 = vrot.slane %v1386_v0, 4 }
 0x444   :  { %v1390_v4 = vpop.eup %1389  ;;  %v637_v6 = vrot.slane %v1388_v2, 3 }
 0x445   :  { %v1392_v7 = vpop.eup %1391  ;;  %v639_v8 = vrot.slane %v1390_v4, 2 }
 0x446   :  { %v1394_v9 = vpop.eup %1393  ;;  %v638_v10 = vsel %vm125_vm1, %v637_v6, %v636_v3  ;;  %v641_v11 = vrot.slane %v1392_v7, 1 }
 0x447   :  { %v1396_v12 = vpop.eup %1395  ;;  %v640_v13 = vsel %vm128_vm2, %v639_v8, %v638_v10  ;;  %v644_v18 = vrot.slane %v1394_v9, 7 }
 0x448   :  { %v1398_v14 = vpop.eup %1397  ;;  %v642_v17 = vsel %vm131_vm3, %v641_v11, %v640_v13  ;;  %v646_v21 = vrot.slane %v1396_v12, 6 }
 0x449   :  { %v643_v20 = vsel %vm134_vm4, %v1384_v63, %v642_v17  ;;  %v648_v23 = vrot.slane %v1398_v14, 5 }
 0x44a   :  { %v645_v22 = vsel %vm137_vm5, %v644_v18, %v643_v20 }
 0x44b   :  { %v647_v25 = vsel %vm140_vm6, %v646_v21, %v645_v22 }
 0x44c   :  { %v649_v26 = vsel %vm143_vm7, %v648_v23, %v647_v25 }
 0x44d   :  { %1232 = vmatmul.mubr.msk.f32.vlgmr.msra.gmra.mrb[4].mxu0 %vm145_vm8, %v649_v26 }
 0x44e   :  { %1305 = vmatpush3.bf16.msra.mxu0 %v1524_v16  ;;  %1253 = vmatprep.mubr.msk.f32.mxu0 %vm1476_vm0, %v1477_v19 }
 0x44f   :  { %1306 = vmatprep.subr.bf16.mxu0 %v1475_v15 }
 0x452   :  { %1308 = vmatpush3.bf16.msra.mxu0 %v1540_v24 }
 0x520   :  { %v718_v28 = vpop.f32.mrb[4].mxu0 }
 0x521   :  { %v723_v29 = vrot.slane %v718_v28, 3  ;;  %v724_v30 = vrot.slane %v718_v28, 4  ;;  %v725_v31 = vrot.slane %v718_v28, 5  ;;  %v726_v32 = vrot.slane %v718_v28, 6  ;;  %v1233_v33 = vpop.f32.mrb[5].mxu0 }
 0x522   :  { %v727_v36 = vrot.slane %v718_v28, 7  ;;  %v728_v37 = vrot.slane %v718_v28, 1  ;;  %v729_v42 = vrot.slane %v718_v28, 2  ;;  %v743_v48 = vadd.f32 %v718_v28, %v1570_v47 }
 0x523   :  { %v738_v38 = vadd.f32 %v723_v29, %v1558_v35  ;;  %v739_v39 = vadd.f32 %v724_v30, %v1556_v34  ;;  %v740_v16 = vadd.f32 %v725_v31, %v1561_v40  ;;  %v741_v43 = vadd.f32 %v726_v32, %v1563_v41 }
 0x524   :  { %v742_v24 = vadd.f32 %v727_v36, %v1568_v46  ;;  %v744_v44 = vadd.f32 %v728_v37, %v1574_v52  ;;  %v745_v45 = vadd.f32 %v729_v42, %v1576_v53 }
 0x525   :  { %1399 = vtanh.f32 %v738_v38 }
 0x526   :  { %1401 = vtanh.f32 %v739_v39 }
 0x527   :  { %1403 = vtanh.f32 %v740_v16 }
 0x528   :  { %1405 = vtanh.f32 %v741_v43 }
 0x529   :  { %1407 = vtanh.f32 %v742_v24 }
 0x52a   :  { %1409 = vtanh.f32 %v744_v44 }
 0x52b   :  { %1411 = vtanh.f32 %v745_v45 }
 0x52c   :  { %1413 = vtanh.f32 %v743_v48 }
 0x52f   :  { %v1400_v49 = vpop.eup %1399 }
 0x530   :  { %v1402_v50 = vpop.eup %1401  ;;  %v762_v51 = vrot.slane %v1400_v49, 5 }
 0x531   :  { %v1404_v54 = vpop.eup %1403  ;;  %v763_v55 = vrot.slane %v1402_v50, 4 }
 0x532   :  { %v1406_v56 = vpop.eup %1405  ;;  %v765_v57 = vrot.slane %v1404_v54, 3 }
 0x533   :  { %v1408_v58 = vpop.eup %1407  ;;  %v764_v59 = vsel %vm125_vm1, %v763_v55, %v762_v51  ;;  %v767_v60 = vrot.slane %v1406_v56, 2 }
 0x534   :  { %v1410_v61 = vpop.eup %1409  ;;  %v766_v62 = vsel %vm128_vm2, %v765_v57, %v764_v59  ;;  %v769_v63 = vrot.slane %v1408_v58, 1 }
 0x535   :  { %v1412_v0 = vpop.eup %1411  ;;  %v768_v2 = vsel %vm131_vm3, %v767_v60, %v766_v62  ;;  %v772_v6 = vrot.slane %v1410_v61, 7  ;;  %v23_v60 = vld [vmem:[%s1764_s2] sm:$0xff]  ;;  %v24_v61 = vld [vmem:[%s1764_s2 + $0x8] sm:$0xff]  ;;  %v25_v62 = vld [vmem:[%s1764_s2 + $0x10] sm:$0xff] }
 0x536   :  { %v1414_v3 = vpop.eup %1413  ;;  %v770_v4 = vsel %vm134_vm4, %v769_v63, %v768_v2  ;;  %v774_v8 = vrot.slane %v1412_v0, 6  ;;  %v1310_v63 = vpack.c.bf16 %v24_v61, %v23_v60  ;;  %v26_v0 = vld [vmem:[%s1764_s2 + $0x18] sm:$0xff]  ;;  %s1478_s2 = smov [#allocation2]  }
 0x537   :  { %v771_v7 = vsel %vm137_vm5, %v1414_v3, %v770_v4  ;;  %v1313_v2 = vpack.c.bf16 %v26_v0, %v25_v62  ;;  %s1123_s6 = sshll.u32 %s1478_s2, 4  ;;  %s1124_s6 = int_to_ptr.vmem [resolvable:$true] %s1123_s6 }
 0x538   :  { %v773_v9 = vsel %vm140_vm6, %v772_v6, %v771_v7  ;;  %s1451_s7 = scalar_lea.vmem %s1124_s6, 128  ;;  %p1456_p1 = scmp.lt.s32.totalorder %s1124_s6, %s1124_s6 }
 0x539   :  { %v775_v10 = vsel %vm143_vm7, %v774_v8, %v773_v9  ;;  %p1452_p0 = scmp.ne.s32.totalorder %s1124_s6, %s1451_s7  ;;  %p1457_p2 = scmp.lt.s32.totalorder %s1451_s7, %s1451_s7 }
 0x53a   :  { %1243 = vmatmul.mubr.msk.f32.vlgmr.msra.gmra.mrb[4].mxu1 %vm145_vm8, %v775_v10 }
 0x53b   :  { %1264 = vmatprep.mubr.msk.f32.mxu1 %vm1476_vm0, %v1477_v19  ;;  %1311 = vmatpush3.bf16.msra.mxu1 %v1310_v63  ;;  %p1458_p3 = por %p1457_p2, %p1456_p1 }
 0x53c   :  { %1312 = vmatprep.subr.bf16.mxu1 %v1475_v15 }
 0x53d   :  { %p1459_p4 = pnand %p1458_p3, %p1452_p0 }
 0x53f   :  { %1314 = vmatpush3.bf16.msra.mxu1 %v1313_v2 }
 0x60d   :  { %v844_v11 = vpop.f32.mrb[4].mxu1 }
 0x60e   :  { %v849_v12 = vrot.slane %v844_v11, 2  ;;  %v850_v13 = vrot.slane %v844_v11, 3  ;;  %v851_v14 = vrot.slane %v844_v11, 4  ;;  %v852_v17 = vrot.slane %v844_v11, 5  ;;  %v1244_v18 = vpop.f32.mrb[5].mxu1 }
 0x60f   :  { %v853_v20 = vrot.slane %v844_v11, 6  ;;  %v854_v21 = vrot.slane %v844_v11, 7  ;;  %v855_v26 = vrot.slane %v844_v11, 1  ;;  %v870_v31 = vadd.f32 %v844_v11, %v1574_v52 }
 0x610   :  { %v864_v22 = vadd.f32 %v849_v12, %v1558_v35  ;;  %v865_v23 = vadd.f32 %v850_v13, %v1556_v34  ;;  %v866_v25 = vadd.f32 %v851_v14, %v1561_v40  ;;  %v867_v28 = vadd.f32 %v852_v17, %v1563_v41 }
 0x611   :  { %v868_v19 = vadd.f32 %v853_v20, %v1568_v46  ;;  %v869_v29 = vadd.f32 %v854_v21, %v1570_v47  ;;  %v871_v30 = vadd.f32 %v855_v26, %v1576_v53 }
 0x612   :  { %1415 = vtanh.f32 %v864_v22 }
 0x613   :  { %1417 = vtanh.f32 %v865_v23 }
 0x614   :  { %1419 = vtanh.f32 %v866_v25 }
 0x615   :  { %1421 = vtanh.f32 %v867_v28 }
 0x616   :  { %1423 = vtanh.f32 %v868_v19 }
 0x617   :  { %1425 = vtanh.f32 %v869_v29 }
 0x618   :  { %1427 = vtanh.f32 %v871_v30 }
 0x619   :  { %1429 = vtanh.f32 %v870_v31 }
 0x61c   :  { %v1416_v32 = vpop.eup %1415 }
 0x61d   :  { %v1418_v33 = vpop.eup %1417  ;;  %v888_v36 = vrot.slane %v1416_v32, 6 }
 0x61e   :  { %v1420_v37 = vpop.eup %1419  ;;  %v889_v38 = vrot.slane %v1418_v33, 5 }
 0x61f   :  { %v1422_v39 = vpop.eup %1421  ;;  %v891_v16 = vrot.slane %v1420_v37, 4 }
 0x620   :  { %v1424_v42 = vpop.eup %1423  ;;  %v890_v43 = vsel %vm125_vm1, %v889_v38, %v888_v36  ;;  %v893_v24 = vrot.slane %v1422_v39, 3 }
 0x621   :  { %v1426_v44 = vpop.eup %1425  ;;  %v892_v45 = vsel %vm128_vm2, %v891_v16, %v890_v43  ;;  %v895_v48 = vrot.slane %v1424_v42, 2  ;;  %v1009_v16 = vrot.slane %v1552_v27, %v44_v5 }
 0x622   :  { %v1428_v49 = vpop.eup %1427  ;;  %v894_v50 = vsel %vm131_vm3, %v893_v24, %v892_v45  ;;  %v897_v51 = vrot.slane %v1426_v44, 1 }
 0x623   :  { %v896_v54 = vsel %vm134_vm4, %v895_v48, %v894_v50  ;;  %v1430_v55 = vpop.eup %1429  ;;  %v900_v57 = vrot.slane %v1428_v49, 7 }
 0x624   :  { %v898_v56 = vsel %vm137_vm5, %v897_v51, %v896_v54 }
 0x625   :  { %v899_v58 = vsel %vm140_vm6, %v1430_v55, %v898_v56 }
 0x626   :  { %v901_v59 = vsel %vm143_vm7, %v900_v57, %v899_v58 }
 0x627   :  { %1254 = vmatmul.mubr.msk.f32.vlgmr.msra.gmra.mrb[6].mxu0 %vm145_vm8, %v901_v59 }
 0x6fa   :  { %v970_v3 = vpop.f32.mrb[6].mxu0 }
 0x6fb   :  { %v975_v4 = vrot.slane %v970_v3, 1  ;;  %v976_v6 = vrot.slane %v970_v3, 2  ;;  %v977_v7 = vrot.slane %v970_v3, 3  ;;  %v978_v8 = vrot.slane %v970_v3, 4  ;;  %v1255_v9 = vpop.f32.mrb[7].mxu0 }
 0x6fc   :  { %v979_v10 = vrot.slane %v970_v3, 5  ;;  %v980_v11 = vrot.slane %v970_v3, 6  ;;  %v981_v17 = vrot.slane %v970_v3, 7 }
 0x6fd   :  { %v990_v12 = vadd.f32 %v975_v4, %v1558_v35  ;;  %v991_v13 = vadd.f32 %v976_v6, %v1556_v34  ;;  %v992_v14 = vadd.f32 %v977_v7, %v1561_v40  ;;  %v993_v18 = vadd.f32 %v978_v8, %v1563_v41 }
 0x6fe   :  { %v994_v15 = vadd.f32 %v979_v10, %v1568_v46  ;;  %v995_v20 = vadd.f32 %v980_v11, %v1570_v47  ;;  %v996_v21 = vadd.f32 %v981_v17, %v1574_v52  ;;  %v997_v35 = vadd.f32 %v970_v3, %v1576_v53 }
 0x6ff   :  { %1431 = vtanh.f32 %v990_v12 }
 0x700   :  { %1433 = vtanh.f32 %v991_v13 }
 0x701   :  { %1435 = vtanh.f32 %v992_v14 }
 0x702   :  { %1437 = vtanh.f32 %v993_v18 }
 0x703   :  { %1439 = vtanh.f32 %v994_v15 }
 0x704   :  { %1441 = vtanh.f32 %v995_v20 }
 0x705   :  { %1443 = vtanh.f32 %v996_v21 }
 0x706   :  { %1445 = vtanh.f32 %v997_v35 }
 0x709   :  { %v1432_v34 = vpop.eup %1431 }
 0x70a   :  { %v1434_v40 = vpop.eup %1433  ;;  %v1018_v22 = vrot.slane %v1432_v34, 7 }
 0x70b   :  { %v1436_v41 = vpop.eup %1435  ;;  %v1019_v23 = vrot.slane %v1434_v40, 6 }
 0x70c   :  { %v1438_v25 = vpop.eup %1437  ;;  %v1021_v46 = vrot.slane %v1436_v41, 5 }
 0x70d   :  { %v1440_v26 = vpop.eup %1439  ;;  %v1020_v47 = vsel %vm125_vm1, %v1019_v23, %v1018_v22  ;;  %v1023_v28 = vrot.slane %v1438_v25, 4 }
 0x70e   :  { %v1442_v19 = vpop.eup %1441  ;;  %v1022_v52 = vsel %vm128_vm2, %v1021_v46, %v1020_v47  ;;  %v1025_v29 = vrot.slane %v1440_v26, 3 }
 0x70f   :  { %v1444_v30 = vpop.eup %1443  ;;  %v1024_v53 = vsel %vm131_vm3, %v1023_v28, %v1022_v52  ;;  %v1027_v31 = vrot.slane %v1442_v19, 2 }
 0x710   :  { %v1026_v32 = vsel %vm134_vm4, %v1025_v29, %v1024_v53  ;;  %v1029_v33 = vrot.slane %v1444_v30, 1  ;;  %v1446_v37 = vpop.eup %1445 }
 0x711   :  { %v1028_v36 = vsel %vm137_vm5, %v1027_v31, %v1026_v32 }
 0x712   :  { %v1030_v38 = vsel %vm140_vm6, %v1029_v33, %v1028_v36 }
 0x713   :  { %v1031_v39 = vsel %vm143_vm7, %v1446_v37, %v1030_v38 }
 0x714   :  { %1265 = vmatmul.mubr.msk.f32.vlgmr.msra.gmra.mrb[6].mxu1 %vm145_vm8, %v1031_v39 }
 0x7e7   :  { %v1100_v42 = vpop.f32.mrb[6].mxu1 }
 0x7e8   :  { %v1101_v43 = vadd.f32 %v1100_v42, %v1009_v16  ;;  %v1266_v24 = vpop.f32.mrb[7].mxu1 }
 0x7ea   :  { %v1105_v44 = vsel %vm1104_vm9, %v1101_v43, -inf }
 0x7eb   :  { %1106 = vmax.xlane.f32.xlu0 %v1105_v44 }
 0x878   :  { %v1107_v45 = vpop.xlane.xlu0 %1106 }
 0x879   :  { %v1108_v48 = vsub.f32 %v1101_v43, %v1107_v45 }
 0x87b   :  { %v1109_v49 = vmul.f32 1.442695, %v1108_v48 }
 0x87d   :  { %1447 = vpow2.f32 %v1109_v49 }
 0x887   :  { %v1448_v50 = vpop.eup %1447 }
 0x888   :  { %v1111_v51 = vsel %vm1104_vm9, %v1448_v50, 0.0 }
 0x889   :  { %1112 = vadd.xlane.f32.xlu1 %v1111_v51 }
 0x916   :  { %v1113_v54 = vpop.xlane.xlu1 %1112 }
 0x917   :  { %1449 = vrcp.f32 %v1113_v54 }
 0x921   :  { %v1450_v1 = vpop.eup %1449 }
 0x922   :  { %v1115_v5 = vmul.f32 %v1450_v1, %v1448_v50 }
 0x924   :  { %1116 = vst.msk [vmem:[#allocation2] sm:$0xff] %vm1104_vm9, %v1115_v5 }
 0x925   :  { %1462 = shalt.err (!%p1459_p4)
}
 0x926   :  { %s1463_s10 = scalar_lea.hbm %s1766_s4, 128 }
 0x927   :  { %p1464_p5 = scmp.ne.s32.totalorder %s1766_s4, %s1463_s10  ;;  %p1467_p6 = scmp.lt.u32.totalorder %s1463_s10, %s1766_s4 }
 0x929   :  { %p1469_p7 = pnand %p1467_p6, %p1464_p5 }
 0x92b   :  { %1472 = shalt.err (!%p1469_p7)
}
 0x92c   :  { %1126 = dma.vmem_to_hbm [thread:$0]  %s1124_s6, 128, %s1766_s4, [#allocation3]  }
 0x92d   :  { %1473 = dma.done.wait [#allocation3], 128  }
 0x92e   :  { %1474 = vsyncadd [#allocation3], 4294967168 }
 0x92f   :  { %1130 = vsyncpa [#allocation3], 1 }

</bundles_post_ra>
